<compile_context>
chip_gen: v7x
topology: tpu7x:2x2x1
jax: 0.10.0
libtpu: 0.0.40
codegen_flags: <defaults>
</compile_context>

<pallas_src>
import functools

import jax
import jax.numpy as jnp
import numpy as np
from jax import lax
from jax.experimental import pallas as pl
from jax.experimental.pallas import tpu as pltpu

EPS = 1e-5  # nn.BatchNorm2d default eps


def _round_up(x, m):
    return -(-x // m) * m


def _vmem_limit_bytes():
    # v5e/v6e: 128 MiB physical VMEM per core; v7x: 64 MiB.  Leave headroom for
    # compiler scratch + double buffers: 64 MiB on v5e/v6e, ~48 MiB on v7x.
    try:
        cap = pltpu.get_tpu_info().vmem_capacity_bytes
    except Exception:
        cap = 64 << 20
    return int(min(64 << 20, (cap * 3) // 4))


# --------------------------------------------------------------------------
# Pass 1: per-image conv (+bias) with in-VMEM patch build + per-image BN partials
# --------------------------------------------------------------------------
def _conv_stats_kernel(w_ref, x_ref, b_ref, msk_ref, conv_ref, stats_ref, *,
                       ksize, w2, mi_out, inv_count):
    # w_ref:    (C_out, k*k*C_in)  weights (grid-resident)
    # x_ref:    (C_in, L_pad)      flat zero-padded image for this grid step
    # b_ref:    (C_out, 1)         bias column (grid-resident)
    # msk_ref:  (1, Mi_out)        1.0 at valid output positions, 0.0 at wrap/pad
    # conv_ref: (C_out, Mi_out)    pre-BN conv output (lane-dense store)
    # stats_ref:(C_out, 2)         per-image [sum, M2] over valid positions
    x = x_ref[...]

    # In-VMEM im2col: tap (kh, kw) of the flat padded image is a static shifted
    # slice of the slab (lane shifts / relayout stay on-chip, never touch HBM).
    taps = []
    for kh in range(ksize):
        for kw in range(ksize):
            off = kh * w2 + kw
            taps.append(x[:, off:off + mi_out])
    patches = jnp.concatenate(taps, axis=0)                   # (k*k*C_in, Mi_out)

    conv = jnp.dot(w_ref[...], patches,
                   preferred_element_type=jnp.float32) + b_ref[...]

    # Per-image BN partials from the f32 accumulator (before any bf16 cast):
    # sum and M2 (sum of squared deviations from the per-image mean) so the
    # cross-image combine can use Chan's formula -> no E[x^2]-mean^2 cancellation.
    mask = msk_ref[...]                                        # (1, Mi_out)
    s1 = jnp.sum(conv * mask, axis=1, keepdims=True)           # (C_out, 1)
    mean = s1 * inv_count
    dev = conv - mean
    m2 = jnp.sum(dev * dev * mask, axis=1, keepdims=True)      # (C_out, 1)
    stats_ref[...] = jnp.concatenate([s1, m2], axis=1)         # (C_out, 2)

    conv_ref[...] = conv.astype(conv_ref.dtype)


# --------------------------------------------------------------------------
# Pass 2: folded BN affine (scale/shift precombined outside) + ReLU
# --------------------------------------------------------------------------
def _bn_relu_kernel(conv_ref, ss_ref, out_ref):
    # conv_ref: (C_out, Mi_out)  pre-BN conv (possibly bf16)
    # ss_ref:   (C_out, 2)       folded per-channel [scale, shift]
    ss = ss_ref[...]
    y = conv_ref[...].astype(jnp.float32) * ss[:, 0:1] + ss[:, 1:2]
    out_ref[...] = jnp.maximum(y, 0.0)                         # ReLU


# --------------------------------------------------------------------------
# Wrapper
# --------------------------------------------------------------------------
@functools.partial(jax.jit, static_argnames=("use_bf16",))
def conv2d_block(x_nchw, weight, bias, gamma, beta, *, use_bf16=True):
    """Forward pass of Conv2dBlock (Conv2d 'same' stride-1 -> BN(train) -> ReLU).

    x_nchw : (N, C_in, H, W) f32
    weight : (C_out, C_in, k, k)  (PyTorch conv weight layout, k odd)
    bias, gamma, beta : (C_out,)
    Returns (N, C_out, H, W) f32.
    """
    n, c_in, h, w = x_nchw.shape
    c_out, _, kh_sz, kw_sz = weight.shape
    assert kh_sz == kw_sz and kh_sz % 2 == 1, "square odd kernels only"
    ksize = kh_sz
    pad = (ksize - 1) // 2
    h2, w2 = h + 2 * pad, w + 2 * pad
    hw = h * w                                   # valid output positions / image
    mi = h * w2                                  # computed positions (incl. wrap cols)
    mi_out = _round_up(mi, 128)                  # lane-dense (unmasked vst) width
    off_max = (ksize - 1) * w2 + (ksize - 1)
    l_pad = _round_up(off_max + mi_out, 128)     # flat padded slab length / image
    k = ksize * ksize * c_in

    in_dtype = jnp.bfloat16 if use_bf16 else jnp.float32
    mid_dtype = jnp.bfloat16 if use_bf16 else jnp.float32

    # ---- wrapper glue: cheap pad + flatten (roughly one input-sized pass) ----
    xp = jnp.pad(x_nchw, ((0, 0), (0, 0), (pad, pad), (pad, pad)))
    x_flat = xp.reshape(n, c_in, h2 * w2)
    x_flat = jnp.pad(x_flat, ((0, 0), (0, 0), (0, l_pad - h2 * w2)))
    x_flat = x_flat.astype(in_dtype)

    # (C_out, C_in, kh, kw) -> (C_out, kh*kw*C_in), matching the in-kernel tap
    # order (tap-major, channel-minor).
    w_m = jnp.transpose(weight, (0, 2, 3, 1)).reshape(c_out, k).astype(in_dtype)
    bias_col = bias.reshape(c_out, 1).astype(jnp.float32)

    # 1.0 at valid output positions (row < H and column < W), 0.0 at wrap/pad.
    pos = jnp.arange(mi_out, dtype=jnp.int32)
    stat_mask = ((pos < mi) & ((pos % w2) < w)).astype(jnp.float32).reshape(1, mi_out)

    vmem_limit = _vmem_limit_bytes()
    mid_bytes = n * c_out * mi_out * jnp.dtype(mid_dtype).itemsize

    # ---- pass 1: conv + bias + per-image BN partials ----
    kernel1 = functools.partial(_conv_stats_kernel, ksize=ksize, w2=w2,
                                mi_out=mi_out, inv_count=1.0 / hw)
    conv_pre, stats = pl.pallas_call(
        kernel1,
        out_shape=(
            jax.ShapeDtypeStruct((n, c_out, mi_out), mid_dtype),
            jax.ShapeDtypeStruct((n, c_out, 2), jnp.float32),
        ),
        grid_spec=pltpu.PrefetchScalarGridSpec(
            num_scalar_prefetch=0,
            grid=(n,),
            in_specs=[
                pl.BlockSpec((c_out, k), lambda i: (0, 0)),              # weights
                pl.BlockSpec((None, c_in, l_pad), lambda i: (i, 0, 0)),  # image slab
                pl.BlockSpec((c_out, 1), lambda i: (0, 0)),              # bias
                pl.BlockSpec((1, mi_out), lambda i: (0, 0)),             # stats mask
            ],
            out_specs=[
                pl.BlockSpec((None, c_out, mi_out), lambda i: (i, 0, 0)),  # conv
                pl.BlockSpec((None, c_out, 2), lambda i: (i, 0, 0)),       # partials
            ],
        ),
        compiler_params=pltpu.CompilerParams(
            dimension_semantics=("parallel",),      # shards images across v7x TCs
            vmem_limit_bytes=vmem_limit,
        ),
        cost_estimate=pl.CostEstimate(
            flops=n * (2 * k * c_out * mi_out + 6 * c_out * mi_out),
            transcendentals=0,
            bytes_accessed=(x_flat.size * x_flat.dtype.itemsize
                            + w_m.size * w_m.dtype.itemsize
                            + mid_bytes + n * c_out * 2 * 4
                            + mi_out * 4 + c_out * 4),
        ),
    )(w_m, x_flat, bias_col, stat_mask)

    # ---- between passes (tiny XLA): Chan-combine stats, fold BN affine ----
    sum_n = stats[:, :, 0]                                    # (N, C_out)
    m2_n = stats[:, :, 1]                                     # (N, C_out)
    mean_n = sum_n / hw
    grand_mean = jnp.mean(mean_n, axis=0)                     # (C_out,)
    m2_total = jnp.sum(m2_n, axis=0) + hw * jnp.sum((mean_n - grand_mean) ** 2, axis=0)
    var = m2_total / (n * hw)                                 # biased (training BN)
    inv_std = lax.rsqrt(var + EPS)
    scale = gamma.astype(jnp.float32) * inv_std
    shift = beta.astype(jnp.float32) - grand_mean * scale
    scale_shift = jnp.stack([scale, shift], axis=1)           # (C_out, 2)

    # ---- pass 2: folded BN affine + ReLU (pure load->FMA->ReLU->store) ----
    y_flat = pl.pallas_call(
        _bn_relu_kernel,
        out_shape=jax.ShapeDtypeStruct((n, c_out, mi_out), jnp.float32),
        grid_spec=pltpu.PrefetchScalarGridSpec(
            num_scalar_prefetch=0,
            grid=(n,),
            in_specs=[
                pl.BlockSpec((None, c_out, mi_out), lambda i: (i, 0, 0)),
                pl.BlockSpec((c_out, 2), lambda i: (0, 0)),
            ],
            out_specs=pl.BlockSpec((None, c_out, mi_out), lambda i: (i, 0, 0)),
        ),
        compiler_params=pltpu.CompilerParams(
            dimension_semantics=("parallel",),
            vmem_limit_bytes=vmem_limit,
        ),
        cost_estimate=pl.CostEstimate(
            flops=3 * n * c_out * mi_out,
            transcendentals=0,
            bytes_accessed=mid_bytes + n * c_out * mi_out * 4 + c_out * 2 * 4,
        ),
    )(conv_pre, scale_shift)

    # ---- wrapper glue: drop wrap/pad columns; already NCHW, no transpose ----
    y = y_flat[:, :, :mi].reshape(n, c_out, h, w2)[:, :, :, :w]
    return y


# --------------------------------------------------------------------------
# Pure-JAX reference (mirrors the PyTorch forward with training-mode BN)
# --------------------------------------------------------------------------
def _reference(x_nchw, weight, bias, gamma, beta):
    dn = lax.conv_dimension_numbers(x_nchw.shape, weight.shape,
                                    ("NCHW", "OIHW", "NCHW"))
    conv = lax.conv_general_dilated(x_nchw, weight, window_strides=(1, 1),
                                    padding="SAME", dimension_numbers=dn)
    conv = conv + bias.reshape(1, -1, 1, 1)
    mean = jnp.mean(conv, axis=(0, 2, 3), keepdims=True)
    var = jnp.mean((conv - mean) ** 2, axis=(0, 2, 3), keepdims=True)
    y = (conv - mean) * lax.rsqrt(var + EPS)
    y = y * gamma.reshape(1, -1, 1, 1) + beta.reshape(1, -1, 1, 1)
    return jnp.maximum(y, 0.0)


if __name__ == "__main__":
    key = jax.random.PRNGKey(0)
    k_x, k_w, k_b, k_g, k_be = jax.random.split(key, 5)

    N, C_IN, C_OUT, H, W = 2, 4, 8, 16, 16

    x = jax.random.normal(k_x, (N, C_IN, H, W), dtype=jnp.float32)
    weight = 0.1 * jax.random.normal(k_w, (C_OUT, C_IN, 3, 3), dtype=jnp.float32)
    bias = 0.1 * jax.random.normal(k_b, (C_OUT,), dtype=jnp.float32)
    gamma = 1.0 + 0.1 * jax.random.normal(k_g, (C_OUT,), dtype=jnp.float32)
    beta = 0.1 * jax.random.normal(k_be, (C_OUT,), dtype=jnp.float32)

    ref = _reference(x, weight, bias, gamma, beta)

    # f32 path: tight tolerance (exercises the same grid/stat structure).
    out_f32 = jax.block_until_ready(
        conv2d_block(x, weight, bias, gamma, beta, use_bf16=False))
    np.testing.assert_allclose(np.asarray(out_f32), np.asarray(ref),
                               rtol=1e-4, atol=1e-4)

    # Default (bf16 MXU inputs + bf16 pre-BN intermediate): looser tolerance to
    # account for bf16 quantization of the conv inputs / intermediate.
    out_bf16 = jax.block_until_ready(conv2d_block(x, weight, bias, gamma, beta))
    np.testing.assert_allclose(np.asarray(out_bf16), np.asarray(ref),
                               rtol=5e-2, atol=5e-2)

    print("KERNEL_OK")
</pallas_src>

<mosaic_0001>
module attributes {stable_mosaic.version = 11 : i64} {
  func.func @_conv_stats_kernel(%arg0: i32, %arg1: memref<8x36xf32, #tpu.memory_space<vmem>>, %arg2: memref<1x4x512xf32, #tpu.memory_space<vmem>>, %arg3: memref<8x1xf32, #tpu.memory_space<vmem>>, %arg4: memref<1x384xf32, #tpu.memory_space<vmem>>, %arg5: memref<1x8x384xf32, #tpu.memory_space<vmem>>, %arg6: memref<1x8x2xf32, #tpu.memory_space<vmem>>) attributes {dimension_semantics = [#tpu.dimension_semantics<parallel>], iteration_bounds = array<i64: 2>, scalar_prefetch = 0 : i64, scratch_operands = 0 : i64, tpu.core_type = #tpu.core_type<tc>, window_params = [{pipeline_mode = #tpu.pipeline_mode<synchronous>, transform_indices = @transform_0, window_bounds = array<i64: 8, 36>}, {transform_indices = @transform_1, window_bounds = array<i64: 1, 4, 512>}, {pipeline_mode = #tpu.pipeline_mode<synchronous>, transform_indices = @transform_2, window_bounds = array<i64: 8, 1>}, {pipeline_mode = #tpu.pipeline_mode<synchronous>, transform_indices = @transform_3, window_bounds = array<i64: 1, 384>}, {transform_indices = @transform_4, window_bounds = array<i64: 1, 8, 384>}, {transform_indices = @transform_5, window_bounds = array<i64: 1, 8, 2>}]} {
    %c0 = arith.constant 0 : index
    %c0_0 = arith.constant 0 : index
    %c0_1 = arith.constant 0 : index
    %0 = vector.load %arg2[%c0, %c0_0, %c0_1] : memref<1x4x512xf32, #tpu.memory_space<vmem>>, vector<1x4x512xf32>
    %1 = vector.shape_cast %0 : vector<1x4x512xf32> to vector<4x512xf32>
    %2 = vector.extract_strided_slice %1 {offsets = [0, 0], sizes = [4, 384], strides = [1, 1]} : vector<4x512xf32> to vector<4x384xf32>
    %3 = vector.extract_strided_slice %1 {offsets = [0, 1], sizes = [4, 384], strides = [1, 1]} : vector<4x512xf32> to vector<4x384xf32>
    %4 = vector.extract_strided_slice %1 {offsets = [0, 2], sizes = [4, 384], strides = [1, 1]} : vector<4x512xf32> to vector<4x384xf32>
    %5 = vector.extract_strided_slice %1 {offsets = [0, 18], sizes = [4, 384], strides = [1, 1]} : vector<4x512xf32> to vector<4x384xf32>
    %6 = vector.extract_strided_slice %1 {offsets = [0, 19], sizes = [4, 384], strides = [1, 1]} : vector<4x512xf32> to vector<4x384xf32>
    %7 = vector.extract_strided_slice %1 {offsets = [0, 20], sizes = [4, 384], strides = [1, 1]} : vector<4x512xf32> to vector<4x384xf32>
    %8 = vector.extract_strided_slice %1 {offsets = [0, 36], sizes = [4, 384], strides = [1, 1]} : vector<4x512xf32> to vector<4x384xf32>
    %9 = vector.extract_strided_slice %1 {offsets = [0, 37], sizes = [4, 384], strides = [1, 1]} : vector<4x512xf32> to vector<4x384xf32>
    %10 = vector.extract_strided_slice %1 {offsets = [0, 38], sizes = [4, 384], strides = [1, 1]} : vector<4x512xf32> to vector<4x384xf32>
    %11 = tpu.concatenate %2, %3, %4, %5, %6, %7, %8, %9, %10 in 0 : vector<4x384xf32>, vector<4x384xf32>, vector<4x384xf32>, vector<4x384xf32>, vector<4x384xf32>, vector<4x384xf32>, vector<4x384xf32>, vector<4x384xf32>, vector<4x384xf32> -> vector<36x384xf32>
    %c0_2 = arith.constant 0 : index
    %c0_3 = arith.constant 0 : index
    %12 = vector.load %arg1[%c0_2, %c0_3] : memref<8x36xf32, #tpu.memory_space<vmem>>, vector<8x36xf32>
    %cst = arith.constant dense<0.000000e+00> : vector<8x384xf32>
    %13 = tpu.matmul %12, %11, %cst {dimension_numbers = #tpu.dot_dimension_numbers<[1], [0], [0], [1], [0, 0, 1, 1], [], []>} : vector<8x36xf32>, vector<36x384xf32>, vector<8x384xf32> -> vector<8x384xf32>
    %c0_4 = arith.constant 0 : index
    %c0_5 = arith.constant 0 : index
    %14 = vector.load %arg3[%c0_4, %c0_5] : memref<8x1xf32, #tpu.memory_space<vmem>>, vector<8x1xf32>
    %15 = vector.broadcast %14 : vector<8x1xf32> to vector<8x384xf32>
    %16 = arith.addf %13, %15 : vector<8x384xf32>
    %c0_6 = arith.constant 0 : index
    %c0_7 = arith.constant 0 : index
    %17 = vector.load %arg4[%c0_6, %c0_7] : memref<1x384xf32, #tpu.memory_space<vmem>>, vector<1x384xf32>
    %18 = vector.broadcast %17 : vector<1x384xf32> to vector<8x384xf32>
    %19 = arith.mulf %16, %18 : vector<8x384xf32>
    %cst_8 = arith.constant dense<0.000000e+00> : vector<8xf32>
    %20 = vector.multi_reduction <add>, %19, %cst_8 [1] : vector<8x384xf32> to vector<8xf32>
    %21 = vector.shape_cast %20 : vector<8xf32> to vector<8x1xf32>
    %cst_9 = arith.constant 3.906250e-03 : f32
    %22 = vector.broadcast %cst_9 : f32 to vector<8x1xf32>
    %23 = arith.mulf %21, %22 : vector<8x1xf32>
    %24 = vector.broadcast %23 : vector<8x1xf32> to vector<8x384xf32>
    %25 = arith.subf %16, %24 : vector<8x384xf32>
    %26 = arith.mulf %25, %25 : vector<8x384xf32>
    %27 = vector.broadcast %17 : vector<1x384xf32> to vector<8x384xf32>
    %28 = arith.mulf %26, %27 : vector<8x384xf32>
    %cst_10 = arith.constant dense<0.000000e+00> : vector<8xf32>
    %29 = vector.multi_reduction <add>, %28, %cst_10 [1] : vector<8x384xf32> to vector<8xf32>
    %30 = vector.shape_cast %29 : vector<8xf32> to vector<8x1xf32>
    %31 = tpu.concatenate %21, %30 in 1 : vector<8x1xf32>, vector<8x1xf32> -> vector<8x2xf32>
    %c0_11 = arith.constant 0 : index
    %c0_12 = arith.constant 0 : index
    %c0_13 = arith.constant 0 : index
    %32 = vector.load %arg6[%c0_11, %c0_12, %c0_13] : memref<1x8x2xf32, #tpu.memory_space<vmem>>, vector<1x8x2xf32>
    %33 = vector.shape_cast %32 : vector<1x8x2xf32> to vector<8x2xf32>
    %34 = vector.shape_cast %31 : vector<8x2xf32> to vector<1x8x2xf32>
    tpu.vector_store %arg6[%c0_11, %c0_12, %c0_13], %34 {strides = array<i32>} : memref<1x8x2xf32, #tpu.memory_space<vmem>>, vector<1x8x2xf32>,
    %c0_14 = arith.constant 0 : index
    %c0_15 = arith.constant 0 : index
    %c0_16 = arith.constant 0 : index
    %35 = vector.load %arg5[%c0_14, %c0_15, %c0_16] : memref<1x8x384xf32, #tpu.memory_space<vmem>>, vector<1x8x384xf32>
    %36 = vector.shape_cast %35 : vector<1x8x384xf32> to vector<8x384xf32>
    %37 = vector.shape_cast %16 : vector<8x384xf32> to vector<1x8x384xf32>
    tpu.vector_store %arg5[%c0_14, %c0_15, %c0_16], %37 {strides = array<i32>} : memref<1x8x384xf32, #tpu.memory_space<vmem>>, vector<1x8x384xf32>,
    return
  }
  func.func @transform_0(%arg0: i32) -> (i32, i32) {
    %c0_i32 = arith.constant 0 : i32
    %c0_i32_0 = arith.constant 0 : i32
    %c0_i32_1 = arith.constant 0 : i32
    return %c0_i32, %c0_i32_0 : i32, i32
  }
  func.func @transform_1(%arg0: i32) -> (i32, i32, i32) {
    %c0_i32 = arith.constant 0 : i32
    %c0_i32_0 = arith.constant 0 : i32
    %c0_i32_1 = arith.constant 0 : i32
    return %arg0, %c0_i32, %c0_i32_0 : i32, i32, i32
  }
  func.func @transform_2(%arg0: i32) -> (i32, i32) {
    %c0_i32 = arith.constant 0 : i32
    %c0_i32_0 = arith.constant 0 : i32
    %c0_i32_1 = arith.constant 0 : i32
    return %c0_i32, %c0_i32_0 : i32, i32
  }
  func.func @transform_3(%arg0: i32) -> (i32, i32) {
    %c0_i32 = arith.constant 0 : i32
    %c0_i32_0 = arith.constant 0 : i32
    %c0_i32_1 = arith.constant 0 : i32
    return %c0_i32, %c0_i32_0 : i32, i32
  }
  func.func @transform_4(%arg0: i32) -> (i32, i32, i32) {
    %c0_i32 = arith.constant 0 : i32
    %c0_i32_0 = arith.constant 0 : i32
    %c0_i32_1 = arith.constant 0 : i32
    return %arg0, %c0_i32, %c0_i32_0 : i32, i32, i32
  }
  func.func @transform_5(%arg0: i32) -> (i32, i32, i32) {
    %c0_i32 = arith.constant 0 : i32
    %c0_i32_0 = arith.constant 0 : i32
    %c0_i32_1 = arith.constant 0 : i32
    return %arg0, %c0_i32, %c0_i32_0 : i32, i32, i32
  }
}

module attributes {stable_mosaic.version = 11 : i64} {
  func.func @_bn_relu_kernel(%arg0: i32, %arg1: memref<1x8x384xf32, #tpu.memory_space<vmem>>, %arg2: memref<8x2xf32, #tpu.memory_space<vmem>>, %arg3: memref<1x8x384xf32, #tpu.memory_space<vmem>>) attributes {dimension_semantics = [#tpu.dimension_semantics<parallel>], iteration_bounds = array<i64: 2>, scalar_prefetch = 0 : i64, scratch_operands = 0 : i64, tpu.core_type = #tpu.core_type<tc>, window_params = [{transform_indices = @transform_0, window_bounds = array<i64: 1, 8, 384>}, {pipeline_mode = #tpu.pipeline_mode<synchronous>, transform_indices = @transform_1, window_bounds = array<i64: 8, 2>}, {transform_indices = @transform_2, window_bounds = array<i64: 1, 8, 384>}]} {
    %c0 = arith.constant 0 : index
    %c0_0 = arith.constant 0 : index
    %0 = vector.load %arg2[%c0, %c0_0] : memref<8x2xf32, #tpu.memory_space<vmem>>, vector<8x2xf32>
    %c0_1 = arith.constant 0 : index
    %c0_2 = arith.constant 0 : index
    %c0_3 = arith.constant 0 : index
    %1 = vector.load %arg1[%c0_1, %c0_2, %c0_3] : memref<1x8x384xf32, #tpu.memory_space<vmem>>, vector<1x8x384xf32>
    %2 = vector.shape_cast %1 : vector<1x8x384xf32> to vector<8x384xf32>
    %3 = vector.extract_strided_slice %0 {offsets = [0, 0], sizes = [8, 1], strides = [1, 1]} : vector<8x2xf32> to vector<8x1xf32>
    %4 = vector.broadcast %3 : vector<8x1xf32> to vector<8x384xf32>
    %5 = arith.mulf %2, %4 : vector<8x384xf32>
    %6 = vector.extract_strided_slice %0 {offsets = [0, 1], sizes = [8, 1], strides = [1, 1]} : vector<8x2xf32> to vector<8x1xf32>
    %7 = vector.broadcast %6 : vector<8x1xf32> to vector<8x384xf32>
    %8 = arith.addf %5, %7 : vector<8x384xf32>
    %cst = arith.constant 0.000000e+00 : f32
    %9 = vector.broadcast %cst : f32 to vector<8x384xf32>
    %10 = arith.maximumf %8, %9 : vector<8x384xf32>
    %c0_4 = arith.constant 0 : index
    %c0_5 = arith.constant 0 : index
    %c0_6 = arith.constant 0 : index
    %11 = vector.load %arg3[%c0_4, %c0_5, %c0_6] : memref<1x8x384xf32, #tpu.memory_space<vmem>>, vector<1x8x384xf32>
    %12 = vector.shape_cast %11 : vector<1x8x384xf32> to vector<8x384xf32>
    %13 = vector.shape_cast %10 : vector<8x384xf32> to vector<1x8x384xf32>
    tpu.vector_store %arg3[%c0_4, %c0_5, %c0_6], %13 {strides = array<i32>} : memref<1x8x384xf32, #tpu.memory_space<vmem>>, vector<1x8x384xf32>,
    return
  }
  func.func @transform_0(%arg0: i32) -> (i32, i32, i32) {
    %c0_i32 = arith.constant 0 : i32
    %c0_i32_0 = arith.constant 0 : i32
    %c0_i32_1 = arith.constant 0 : i32
    return %arg0, %c0_i32, %c0_i32_0 : i32, i32, i32
  }
  func.func @transform_1(%arg0: i32) -> (i32, i32) {
    %c0_i32 = arith.constant 0 : i32
    %c0_i32_0 = arith.constant 0 : i32
    %c0_i32_1 = arith.constant 0 : i32
    return %c0_i32, %c0_i32_0 : i32, i32
  }
  func.func @transform_2(%arg0: i32) -> (i32, i32, i32) {
    %c0_i32 = arith.constant 0 : i32
    %c0_i32_0 = arith.constant 0 : i32
    %c0_i32_1 = arith.constant 0 : i32
    return %arg0, %c0_i32, %c0_i32_0 : i32, i32, i32
  }
}

</mosaic_0001>

<bundles_post_ra>
// kernel: conv2d_block.3
= control target key start
LH: loop header
LB: loop body
LE: loop exit
PB: predicated region body
PF: predicated region fallthrough
CT: control target
= control target key end

     0   :  { %s271_s9 = smov 0   ;;  %s291_s0 = inlined_call_operand.vmem [shape: f32[2,8,384], index: 0, kind: input, shape index: {}]   ;;  %s292_s1 = inlined_call_operand.vmem [shape: f32[8,2], index: 1, kind: input, shape index: {}]   ;;  %s293_s2 = inlined_call_operand.vmem [shape: f32[2,8,384], index: 2, kind: output, shape index: {}]  }
   0x1 LB: > { %s224_s10 = sadd.s32 4294967295, %s252_s9   ;;  %p228_p0 = scmp.ge.s32.totalorder %s252_s9, 1  ;;  %s252_s9 = sphi %s271_s9, %s12_s9  }
   0x2   : > { %p112_p1 = scmp.lt.s32.totalorder %s252_s9, 3 }
   0x4   : > { %p113_p2 = pnand %p228_p0, %p112_p1 }
   0x5   : > { %v144_v0 = vld [vmem:[%s292_s1] sm:$0xff] (!%p113_p2)  ;;  %v254_v1 = vmov (!%p113_p2), 0   ;;  %v255_v2 = vmov (!%p113_p2), 1   ;;  %p134_p3 = scmp.lt.s32.totalorder (!%p113_p2), %s224_s10, 1 }
   0x6   : > { %116 = sbr.rel (%p113_p2) target bundleno = 146 (0x92), region = 28  ;;  %244 = vset.pattern.permute.xlu0 (!%p113_p2), %v254_v1 }
   0x7   : > { %150 = vperm.xlu0 (!%p113_p2), %244, %v144_v0  }
   0xb   : > { %245 = vset.pattern.permute.xlu0 (!%p113_p2), %v255_v2 }
   0xc   : > { %157 = vperm.xlu0 (!%p113_p2), %245, %v144_v0  }
   0xd   : > { %s295_s10 = smov (!%p134_p3, %s224_s10), 1 }
   0xe   : > { %s233_s13 = smul.u32 24, %s295_s10 }
  0x10   : > { %s138_s16 = scalar_lea.vmem %s291_s0, %s233_s13  ;;  %s143_s19 = scalar_lea.vmem %s293_s2, %s233_s13 }
  0x11   : > { %v145_v4 = vld [vmem:[%s138_s16] sm:$0xff]  ;;  %v146_v5 = vld [vmem:[%s138_s16 + $0x8] sm:$0xff]  ;;  %v147_v6 = vld [vmem:[%s138_s16 + $0x10] sm:$0xff] }
  0x86   : > { %v151_v3 = vpop.permute.xlu0 %150 }
  0x87   : > { %v153_v7 = vmul.f32 %v151_v3, %v145_v4  ;;  %v154_v8 = vmul.f32 %v151_v3, %v146_v5  ;;  %v155_v9 = vmul.f32 %v151_v3, %v147_v6 }
  0x8b   : > { %v158_v10 = vpop.permute.xlu0 %157 }
  0x8c   : > { %v160_v11 = vadd.f32 %v158_v10, %v153_v7  ;;  %v161_v12 = vadd.f32 %v158_v10, %v154_v8  ;;  %v162_v13 = vadd.f32 %v158_v10, %v155_v9 }
  0x8e   : > { %v163_v14 = vmax.f32 %v160_v11, 0.0  ;;  %v164_v15 = vmax.f32 %v161_v12, 0.0  ;;  %v165_v16 = vmax.f32 %v162_v13, 0.0 }
  0x90   : > { %166 = vst [vmem:[%s143_s19] sm:$0xff] %v163_v14  ;;  %167 = vst [vmem:[%s143_s19 + $0x8] sm:$0xff] %v164_v15 }
  0x91   : > { %168 = vst [vmem:[%s143_s19 + $0x10] sm:$0xff] %v165_v16 }
  0x92 PF: > { %s12_s9 = sadd.s32 1, %s252_s9  }
  0x93   : > { %p9_p4 = scmp.ge.s32.totalorder %s12_s9, 4  }
  0x95   :  { %11 = sbr.rel (!%p9_p4) target bundleno = 1 (0x1), region = 58 }

// kernel: conv2d_block.2
= control target key start
LH: loop header
LB: loop body
LE: loop exit
PB: predicated region body
PF: predicated region fallthrough
CT: control target
= control target key end

     0   :  { %s860_s18 = smov 0   ;;  %s963_s0 = inlined_call_operand.vmem [shape: f32[8,36], index: 0, kind: input, shape index: {}]   ;;  %s964_s1 = inlined_call_operand.vmem [shape: f32[2,4,512], index: 1, kind: input, shape index: {}]   ;;  %s965_s2 = inlined_call_operand.vmem [shape: f32[8,1], index: 2, kind: input, shape index: {}]   ;;  %s966_s3 = inlined_call_operand.vmem [shape: f32[1,384], index: 3, kind: input, shape index: {}]   ;;  %s967_s4 = inlined_call_operand.vmem [shape: f32[2,8,384], index: 4, kind: output, shape index: {0}]   ;;  %s968_s5 = inlined_call_operand.vmem [shape: f32[2,8,2], index: 5, kind: output, shape index: {1}]  }
   0x1 LB: > { %s664_s19 = sadd.s32 4294967295, %s816_s18   ;;  %p668_p0 = scmp.ge.s32.totalorder %s816_s18, 1  ;;  %s816_s18 = sphi %s860_s18, %s16_s18  }
   0x2   : > { %p190_p1 = scmp.lt.s32.totalorder %s816_s18, 3 }
   0x4   : > { %p191_p2 = pnand %p668_p0, %p190_p1 }
   0x5   : > { %p222_p3 = scmp.lt.s32.totalorder (!%p191_p2), %s664_s19, 1  ;;  %s818_s24 = smov (!%p191_p2), 110   ;;  %v820_v9 = vmov (!%p191_p2), 0.0|0.0   ;;  %v826_v11 = vmov (!%p191_p2), 0.0   ;;  %vm827_vm0 = vmmov (!%p191_p2), 0   ;;  %v828_v12 = vmov (!%p191_p2), 0  }
   0x6   : > { %194 = sbr.rel (%p191_p2) target bundleno = 690 (0x2b2), region = 36  ;;  %s819_s25 = smov (!%p191_p2), 127   ;;  %708 = vmatprep.subr.bf16.mxu1 (!%p191_p2), %v820_v9  ;;  %456 = vmatprep.mubr.f32.mxu0 (!%p191_p2), %v826_v11  ;;  %v376_v13 = vld [vmem:[%s965_s2] sm:$0xff] (!%p191_p2)  ;;  %vm252_vm1 = vcmask (!%p191_p2), 1039360   ;;  %vm268_vm2 = vcmask (!%p191_p2), 1031168   ;;  %vm283_vm3 = vcmask (!%p191_p2), 900096  }
   0x7   : > { %s821_s26 = smov (!%p191_p2), 126   ;;  %s822_s27 = smov (!%p191_p2), 108   ;;  %697 = vmatprep.mubr.msk.f32.mxu1 (!%p191_p2), %vm827_vm0, %v826_v11  ;;  %805 = vset.pattern.permute.xlu0 (!%p191_p2), %v828_v12  ;;  %vm362_vm4 = vcmask (!%p191_p2), 1043456   ;;  %vm313_vm5 = vcmask (!%p191_p2), 883712   ;;  %vm298_vm6 = vcmask (!%p191_p2), 891904   ;;  %vm343_vm7 = vcmask (!%p191_p2), 744448  }
   0x8   : > { %s823_s28 = smov (!%p191_p2), 109   ;;  %s824_s29 = smov (!%p191_p2), 91   ;;  %vm328_vm8 = vcmask (!%p191_p2), 752640   ;;  %vm358_vm9 = vcmask (!%p191_p2), 736256   ;;  %vm382_vm10 = vcmask (!%p191_p2), 293888   ;;  %vm571_vm11 = vcmask (!%p191_p2), 7168  }
   0x9   : > { %s825_s30 = smov (!%p191_p2), 92   ;;  %s829_s6 = smov (!%p191_p2), 90   ;;  %vm573_vm12 = vcmask (!%p191_p2), 15360  }
   0xd   : > { %s970_s19 = smov (!%p222_p3, %s664_s19), 1 }
   0xe   : > { %s680_s20 = sshll.u32 %s970_s19, 4  ;;  %s714_s11 = smul.u32 24, %s970_s19 }
   0xf   : > { %s226_s23 = scalar_lea.vmem %s964_s1, %s680_s20  ;;  %s672_s17 = sshll.u32 %s970_s19, 3 }
  0x10   : > { %v874_v0 = vld [vmem:[%s226_s23] sm:$0xff]  ;;  %v876_v1 = vld [vmem:[%s226_s23 + $0x8] sm:$0xff]  ;;  %s231_s16 = scalar_lea.vmem %s967_s4, %s714_s11  ;;  %s235_s22 = scalar_lea.vmem %s968_s5, %s672_s17 }
  0x11   : > { %v243_v2 = vcombine.low %v876_v1, %v876_v1  ;;  %v242_v3 = vcombine.low %v874_v0, %v874_v0  ;;  %v884_v4 = vcombine.high %v874_v0, %v874_v0  ;;  %v259_v8 = vcombine.high %v876_v1, %v876_v1 }
  0x13   : > { %v745_v5 = vpack.i.bf16 %v243_v2, %v874_v0  ;;  %v750_v6 = vpack.i.bf16 %v876_v1, %v242_v3  ;;  %v740_v7 = vpack.i.bf16 %v876_v1, %v884_v4  ;;  %v755_v10 = vpack.i.bf16 %v259_v8, %v874_v0 }
  0x15   : > { %746 = vrot.lane.b32.xlu1 %v745_v5, %s818_s24  ;;  %736 = vrot.lane.b32.xlu0 %v745_v5, %s819_s25 }
  0x19   : > { %751 = vrot.lane.b32.xlu1 %v750_v6, %s819_s25  ;;  %741 = vrot.lane.b32.xlu0 %v740_v7, %s821_s26 }
  0x1d   : > { %761 = vrot.lane.b32.xlu1 %v750_v6, %s818_s24  ;;  %756 = vrot.lane.b32.xlu0 %v755_v10, %s821_s26 }
  0x21   : > { %771 = vrot.lane.b32.xlu1 %v745_v5, %s822_s27  ;;  %766 = vrot.lane.b32.xlu0 %v740_v7, %s823_s28 }
  0x25   : > { %781 = vrot.lane.b32.xlu1 %v745_v5, %s824_s29  ;;  %776 = vrot.lane.b32.xlu0 %v740_v7, %s825_s30 }
  0x29   : > { %791 = vrot.lane.b32.xlu1 %v750_v6, %s822_s27  ;;  %786 = vrot.lane.b32.xlu0 %v755_v10, %s823_s28 }
  0x2d   : > { %801 = vrot.lane.b32.xlu1 %v750_v6, %s824_s29  ;;  %796 = vrot.lane.b32.xlu0 %v755_v10, %s825_s30 }
  0x31   : > { %354 = vrot.lane.b32.xlu1 %v876_v1, %s829_s6  ;;  %352 = vrot.lane.b32.xlu0 %v884_v4, %s829_s6 }
  0x35   : > { %356 = vrot.lane.b32.xlu1 %v259_v8, %s829_s6  ;;  %350 = vrot.lane.b32.xlu0 %v874_v0, %s829_s6 }
  0x39   : > { %379 = vperm.xlu0 %805, %v376_v13  }
  0x87   : > { %v747_v14 = vpop.permute.xlu1 %746  ;;  %v737_v15 = vpop.permute.xlu0 %736 }
  0x88   : > { %v739_v16 = vunpack.i.h.bf16 %v737_v15  ;;  %v738_v17 = vunpack.i.l.bf16 %v737_v15  ;;  %v749_v18 = vunpack.i.h.bf16 %v747_v14  ;;  %v748_v19 = vunpack.i.l.bf16 %v747_v14 }
  0x8a   : > { %v254_v22 = vsel %vm252_vm1, %v738_v17, %v739_v16  ;;  %v285_v28 = vsel %vm283_vm3, %v748_v19, %v749_v18 }
  0x8b   : > { %v752_v20 = vpop.permute.xlu1 %751  ;;  %v742_v21 = vpop.permute.xlu0 %741  ;;  %v364_v31 = vsel %vm362_vm4, %v884_v4, %v254_v22 }
  0x8c   : > { %v754_v23 = vunpack.i.h.bf16 %v752_v20  ;;  %v753_v24 = vunpack.i.l.bf16 %v752_v20  ;;  %v744_v25 = vunpack.i.h.bf16 %v742_v21  ;;  %v743_v26 = vunpack.i.l.bf16 %v742_v21 }
  0x8e   : > { %v270_v27 = vsel %vm268_vm2, %v743_v26, %v744_v25  ;;  %v253_v33 = vsel %vm252_vm1, %v753_v24, %v738_v17  ;;  %v255_v34 = vsel %vm252_vm1, %v739_v16, %v754_v23 }
  0x8f   : > { %v762_v29 = vpop.permute.xlu1 %761  ;;  %v757_v30 = vpop.permute.xlu0 %756  ;;  %v367_v32 = vsel %vm362_vm4, %v270_v27, %v285_v28  ;;  %v363_v46 = vsel %vm362_vm4, %v874_v0, %v253_v33  ;;  %v365_v48 = vsel %vm362_vm4, %v876_v1, %v255_v34 }
  0x90   : > { %v764_v35 = vunpack.i.h.bf16 %v762_v29  ;;  %v763_v36 = vunpack.i.l.bf16 %v762_v29  ;;  %v759_v37 = vunpack.i.h.bf16 %v757_v30  ;;  %v758_v38 = vunpack.i.l.bf16 %v757_v30 }
  0x91   : > { %v700_v39 = vpack.c.bf16 %v367_v32, %v364_v31 }
  0x92   : > { %v269_v40 = vsel %vm268_vm2, %v758_v38, %v743_v26  ;;  %v284_v41 = vsel %vm283_vm3, %v763_v36, %v748_v19  ;;  %v271_v42 = vsel %vm268_vm2, %v744_v25, %v759_v37  ;;  %v286_v43 = vsel %vm283_vm3, %v749_v18, %v764_v35 }
  0x93   : > { %701 = vmatprep.subr.bf16.mxu0 %v700_v39  ;;  %v772_v44 = vpop.permute.xlu1 %771  ;;  %v767_v45 = vpop.permute.xlu0 %766  ;;  %v366_v47 = vsel %vm362_vm4, %v269_v40, %v284_v41  ;;  %v368_v49 = vsel %vm362_vm4, %v271_v42, %v286_v43  ;;  %v375_v39 = vld [vmem:[%s963_s0] sm:$0xff]  ;;  %v535_v40 = vlaneseq }
  0x94   : > { %v774_v50 = vunpack.i.h.bf16 %v772_v44  ;;  %v773_v51 = vunpack.i.l.bf16 %v772_v44  ;;  %v769_v52 = vunpack.i.h.bf16 %v767_v45  ;;  %v768_v53 = vunpack.i.l.bf16 %v767_v45 }
  0x95   : > { %v702_v54 = vpack.c.bf16 %v366_v47, %v363_v46  ;;  %v709_v55 = vpack.c.bf16 %v368_v49, %v365_v48  ;;  %v536_v41 = vshrl.u32 %v535_v40, 7 }
  0x96   : > { %v315_v56 = vsel %vm313_vm5, %v773_v51, %v774_v50  ;;  %v300_v57 = vsel %vm298_vm6, %v768_v53, %v769_v52 }
  0x97   : > { %703 = vmatpush1.bf16.msra.mxu0 %v702_v54  ;;  %710 = vmatpush3.bf16.msra.mxu1 %v709_v55  ;;  %v782_v58 = vpop.permute.xlu1 %781  ;;  %v777_v59 = vpop.permute.xlu0 %776  ;;  %v370_v4 = vsel %vm362_vm4, %v300_v57, %v315_v56  ;;  %v537_v42 = vsub.s32 0, %v536_v41  ;;  %v541_v43 = vsub.s32 1, %v536_v41  ;;  %v545_v45 = vsub.s32 2, %v536_v41 }
  0x98   : > { %v784_v60 = vunpack.i.h.bf16 %v782_v58  ;;  %v783_v61 = vunpack.i.l.bf16 %v782_v58  ;;  %v779_v62 = vunpack.i.h.bf16 %v777_v59  ;;  %v778_v63 = vunpack.i.l.bf16 %v777_v59  ;;  %711 = vmatprep.subr.bf16.mxu1 %v820_v9 }
  0x9a   : > { %v345_v0 = vsel %vm343_vm7, %v783_v61, %v784_v60  ;;  %v330_v1 = vsel %vm328_vm8, %v778_v63, %v779_v62 }
  0x9b   : > { %v792_v2 = vpop.permute.xlu1 %791  ;;  %v787_v3 = vpop.permute.xlu0 %786  ;;  %v373_v5 = vsel %vm362_vm4, %v330_v1, %v345_v0 }
  0x9c   : > { %v794_v6 = vunpack.i.h.bf16 %v792_v2  ;;  %v793_v7 = vunpack.i.l.bf16 %v792_v2  ;;  %v789_v8 = vunpack.i.h.bf16 %v787_v3  ;;  %v788_v10 = vunpack.i.l.bf16 %v787_v3 }
  0x9d   : > { %v704_v12 = vpack.c.bf16 %v373_v5, %v370_v4 }
  0x9e   : > { %v314_v13 = vsel %vm313_vm5, %v793_v7, %v773_v51  ;;  %v316_v14 = vsel %vm313_vm5, %v774_v50, %v794_v6  ;;  %v299_v9 = vsel %vm298_vm6, %v788_v10, %v768_v53  ;;  %v301_v15 = vsel %vm298_vm6, %v769_v52, %v789_v8 }
  0x9f   : > { %705 = vmatprep.subr.bf16.mxu0 %v704_v12  ;;  %v802_v16 = vpop.permute.xlu1 %801  ;;  %v797_v17 = vpop.permute.xlu0 %796  ;;  %v369_v28 = vsel %vm362_vm4, %v299_v9, %v314_v13  ;;  %v371_v30 = vsel %vm362_vm4, %v301_v15, %v316_v14 }
  0xa0   : > { %v804_v18 = vunpack.i.h.bf16 %v802_v16  ;;  %v803_v19 = vunpack.i.l.bf16 %v802_v16  ;;  %v799_v20 = vunpack.i.h.bf16 %v797_v17  ;;  %v798_v21 = vunpack.i.l.bf16 %v797_v17 }
  0xa2   : > { %v344_v22 = vsel %vm343_vm7, %v803_v19, %v783_v61  ;;  %v346_v23 = vsel %vm343_vm7, %v784_v60, %v804_v18  ;;  %v329_v24 = vsel %vm328_vm8, %v798_v21, %v778_v63  ;;  %v331_v25 = vsel %vm328_vm8, %v779_v62, %v799_v20 }
  0xa3   : > { %v355_v26 = vpop.permute.xlu1 %354  ;;  %v353_v27 = vpop.permute.xlu0 %352  ;;  %v372_v29 = vsel %vm362_vm4, %v329_v24, %v344_v22  ;;  %v374_v31 = vsel %vm362_vm4, %v331_v25, %v346_v23 }
  0xa4   : > { %v360_v32 = vsel %vm358_vm9, %v353_v27, %v355_v26  ;;  %v706_v33 = vpack.c.bf16 %v372_v29, %v369_v28  ;;  %v712_v34 = vpack.c.bf16 %v374_v31, %v371_v30 }
  0xa6   : > { %707 = vmatpush1.bf16.msra.mxu0 %v706_v33  ;;  %713 = vmatpush3.bf16.msra.mxu1 %v712_v34 }
  0xa7   : > { %v357_v35 = vpop.permute.xlu1 %356  ;;  %v351_v36 = vpop.permute.xlu0 %350  ;;  %673 = vmatprep.subr.msk.mxu0 %vm362_vm4, %v360_v32  ;;  %695 = vmatprep.subr.mxu1 %v826_v11  ;;  %v533_v11 = vld [vmem:[%s966_s3] sm:$0x7] }
  0xa8   : > { %v361_v37 = vsel %vm358_vm9, %v355_v26, %v357_v35  ;;  %v359_v38 = vsel %vm358_vm9, %v351_v36, %v353_v27  ;;  %v538_v46 = vrot.slane %v533_v11, %v537_v42  ;;  %v542_v48 = vrot.slane %v533_v11, %v541_v43 }
  0xa9   : > { %v546_v55 = vrot.slane %v533_v11, %v545_v45 }
  0xaa   : > { %674 = vmatpush1.msk.msra.mxu0 %vm362_vm4, %v359_v38  ;;  %696 = vmatpush3.msk.msra.mxu1 %vm362_vm4, %v361_v37 }
  0xab   : > { %675 = vmatmul.mubr.msk.f32.vlgmr.msra.gmra.mrb[0].mxu0 %vm382_vm10, %v375_v39  ;;  %698 = vmatmul.mubr.msk.f32.vlgmr.msra.gmra.mrb[0].mxu1 %vm382_vm10, %v375_v39 }
  0xb8   : > { %v380_v44 = vpop.permute.xlu0 %379 }
 0x17e   : > { %v458_v47 = vpop.f32.mrb[0].mxu0  ;;  %v529_v49 = vpop.f32.mrb[0].mxu1 }
 0x17f   : > { %v459_v50 = vadd.f32 %v458_v47, %v380_v44  ;;  %v460_v51 = vpop.f32.mrb[1].mxu0  ;;  %v530_v52 = vadd.f32 %v529_v49, %v380_v44  ;;  %v699_v53 = vpop.f32.mrb[1].mxu1 }
 0x180   : > { %v461_v54 = vadd.f32 %v460_v51, %v380_v44 }
 0x181   : > { %v550_v56 = vmul.f32 %v538_v46, %v459_v50  ;;  %575 = vst [vmem:[%s231_s16] sm:$0xff] %v459_v50  ;;  %577 = vst [vmem:[%s231_s16 + $0x10] sm:$0xff] %v530_v52  ;;  %v552_v58 = vmul.f32 %v546_v55, %v530_v52 }
 0x182   : > { %v551_v57 = vmul.f32 %v542_v48, %v461_v54  ;;  %576 = vst [vmem:[%s231_s16 + $0x8] sm:$0xff] %v461_v54 }
 0x184   : > { %v553_v59 = vadd.f32 %v551_v57, %v550_v56 }
 0x186   : > { %v554_v60 = vadd.f32 %v553_v59, %v552_v58 }
 0x188   : > { %555 = vadd.xlane.f32.xlu1 %v554_v60 }
 0x215   : > { %v556_v61 = vpop.xlane.xlu1 %555 }
 0x216   : > { %v557_v62 = vmul.f32 0.00390625, %v556_v61 }
 0x218   : > { %v558_v63 = vsub.f32 %v459_v50, %v557_v62  ;;  %v559_v0 = vsub.f32 %v461_v54, %v557_v62  ;;  %v560_v1 = vsub.f32 %v530_v52, %v557_v62 }
 0x21a   : > { %v561_v2 = vmul.f32 %v558_v63, %v558_v63  ;;  %v562_v3 = vmul.f32 %v559_v0, %v559_v0  ;;  %v563_v4 = vmul.f32 %v560_v1, %v560_v1 }
 0x21c   : > { %v564_v5 = vmul.f32 %v561_v2, %v538_v46  ;;  %v565_v6 = vmul.f32 %v562_v3, %v542_v48  ;;  %v566_v7 = vmul.f32 %v563_v4, %v546_v55 }
 0x21e   : > { %v567_v8 = vadd.f32 %v565_v6, %v564_v5 }
 0x220   : > { %v568_v10 = vadd.f32 %v567_v8, %v566_v7 }
 0x222   : > { %569 = vadd.xlane.f32.xlu0 %v568_v10 }
 0x2af   : > { %v570_v12 = vpop.xlane.xlu0 %569 }
 0x2b0   : > { %v572_v13 = vsel %vm571_vm11, %v556_v61, %v570_v12 }
 0x2b1   : > { %574 = vst.msk [vmem:[%s235_s22] sm:$0xff] %vm573_vm12, %v572_v13 }
 0x2b2 PF: > { %s16_s18 = sadd.s32 1, %s816_s18  }
 0x2b3   : > { %p13_p4 = scmp.ge.s32.totalorder %s16_s18, 4  }
 0x2b5   :  { %15 = sbr.rel (!%p13_p4) target bundleno = 1 (0x1), region = 78 }

</bundles_post_ra>
